<compile_context>
chip_gen: v7x
topology: tpu7x:2x2x1
jax: 0.10.0
libtpu: 0.0.40
codegen_flags: <defaults>
</compile_context>

<pallas_src>
import functools

import jax
import jax.numpy as jnp
from jax.experimental import pallas as pl
from jax.experimental.pallas import tpu as pltpu


def _conv_prelu_kernel(x_ref, w_ref, b_ref, a_ref, o_ref, *, kh, kw, th, out_w):
    """Fused kxk 'same' conv + bias + PReLU for one halo'd row tile.

    x_ref: (1, th + kh - 1, out_w + kw - 1, Cin)   padded input rows (VMEM)
    w_ref: (kh * kw * Cin, Cout)                   weight slab, tap-major (kh, kw, cin)
    b_ref: (1, Cout)                               bias (VMEM)
    a_ref: (1, 1)                                  PReLU alpha (SMEM scalar)
    o_ref: (1, th, out_w, Cout)                    output rows, channels-last (VMEM)
    """
    cin = x_ref.shape[-1]
    cout = w_ref.shape[-1]
    x = x_ref[0]  # (th+kh-1, out_w+kw-1, cin)

    # im2col: each shifted window is sliced exactly once; tap order (kh, kw, cin)
    # matches the weight slab, so ONE MXU matmul with K = kh*kw*Cin performs all tap
    # accumulation (no per-tap push/drain cadence, no traced VPU add chain).
    taps = [x[i:i + th, j:j + out_w, :] for i in range(kh) for j in range(kw)]
    patch = jnp.concatenate(taps, axis=-1)                  # (th, out_w, kh*kw*cin)
    # Collapse of the two leading dims only (out_w % 8 == 0) -> layout-preserving.
    patch = patch.reshape(th * out_w, kh * kw * cin)

    acc = jnp.dot(patch, w_ref[...], preferred_element_type=jnp.float32)
    acc = acc + b_ref[...].astype(jnp.float32)

    alpha = a_ref[0, 0]
    y = jnp.where(acc >= 0, acc, alpha * acc)

    # Split of major/sublane dims only; the lane axis (Cout) is untouched, so the
    # store needs no cross-lane relayout.  With the module default Cout=256 this is
    # a dense, unmasked full-width store.
    o_ref[...] = y.reshape(1, th, out_w, cout).astype(o_ref.dtype)


def conv_prelu_pallas(x_tiles, w_slab, b, alpha, *, th, out_w, kh, kw):
    """x_tiles: (NT, th+kh-1, out_w+kw-1, Cin) halo'd row tiles.

    Returns (NT, th, out_w, Cout) with conv + bias + PReLU applied, channels-last.
    """
    nt_total, thp, wp, cin = x_tiles.shape
    kkc, cout = w_slab.shape
    b2 = b.reshape(1, cout).astype(jnp.float32)
    a2 = jnp.asarray(alpha, jnp.float32).reshape(1, 1)

    kernel = functools.partial(_conv_prelu_kernel, kh=kh, kw=kw, th=th, out_w=out_w)

    return pl.pallas_call(
        kernel,
        out_shape=jax.ShapeDtypeStruct((nt_total, th, out_w, cout), x_tiles.dtype),
        grid_spec=pltpu.PrefetchScalarGridSpec(
            num_scalar_prefetch=0,
            grid=(nt_total,),
            in_specs=[
                # One halo'd row tile per grid step (bounded per-step VMEM).
                pl.BlockSpec((1, thp, wp, cin), lambda t: (t, 0, 0, 0)),
                # Weight slab + bias are small, constant index map -> stay resident.
                pl.BlockSpec((kkc, cout), lambda t: (0, 0)),
                pl.BlockSpec((1, cout), lambda t: (0, 0)),
                # PReLU alpha: single scalar in SMEM, no padded VMEM tile.
                pl.BlockSpec(memory_space=pltpu.MemorySpace.SMEM),
            ],
            out_specs=pl.BlockSpec((1, th, out_w, cout), lambda t: (t, 0, 0, 0)),
        ),
        compiler_params=pltpu.CompilerParams(
            dimension_semantics=("parallel",),
        ),
    )(x_tiles, w_slab, b2, a2)


def subpixel_conv_block(x_nchw, w_oihw, b, alpha, *, scaling_factor, row_tile=8):
    """Full forward: Conv2d('same') -> PixelShuffle -> PReLU.  Input/output NCHW."""
    n, cin, h, w = x_nchw.shape
    cout, _, kh, kw = w_oihw.shape
    assert kh % 2 == 1 and kw % 2 == 1, "same-padding path assumes odd kernel size"
    ph, pw = kh // 2, kw // 2
    r = scaling_factor

    th = min(row_tile, h)
    nt = -(-h // th)
    h_pad = nt * th

    # --- layout glue in (NCHW module contract): NCHW->NHWC, zero 'same' pad, and
    # split H into overlapping (halo) row tiles.  XLA fuses these copies.
    x_nhwc = jnp.transpose(x_nchw, (0, 2, 3, 1))
    x_p = jnp.pad(x_nhwc, ((0, 0), (ph, ph + h_pad - h), (pw, pw), (0, 0)))
    tiles = jnp.stack(
        [x_p[:, i * th: i * th + th + kh - 1] for i in range(nt)], axis=1
    )  # (N, NT, th+kh-1, w+kw-1, Cin)
    tiles = tiles.reshape(n * nt, th + kh - 1, w + kw - 1, cin)

    # OIHW -> (kh*kw*cin, cout) slab, tap-major (kh, kw, cin) to match kernel im2col.
    # Weights are cast to the activation dtype (bf16 activations -> bf16 MXU feed).
    w_slab = jnp.transpose(w_oihw, (2, 3, 1, 0)).reshape(kh * kw * cin, cout)
    w_slab = w_slab.astype(x_nchw.dtype)

    y = conv_prelu_pallas(tiles, w_slab, b, alpha, th=th, out_w=w, kh=kh, kw=kw)

    # --- layout glue out: PixelShuffle + NHWC->NCHW as a single transpose.  Valid
    # because PReLU here has one shared alpha, so it commutes with the shuffle.
    y = y.reshape(n, h_pad, w, cout)[:, :h]            # (N, H, W, Cout)
    c_out = cout // (r * r)
    y = y.reshape(n, h, w, c_out, r, r)
    y = jnp.transpose(y, (0, 3, 1, 4, 2, 5))           # (N, C, H, r, W, r)
    return y.reshape(n, c_out, h * r, w * r)


def pixel_shuffle_nchw(x, r):
    """PyTorch nn.PixelShuffle semantics on NCHW input (reference only)."""
    n, crr, h, w = x.shape
    c = crr // (r * r)
    x = x.reshape(n, c, r, r, h, w)
    x = jnp.transpose(x, (0, 1, 4, 2, 5, 3))
    return x.reshape(n, c, h * r, w * r)


def _reference(x_nchw, w_oihw, b, alpha, *, scaling_factor):
    """Pure-JAX reference (lax conv) for a correctness check."""
    y = jax.lax.conv_general_dilated(
        x_nchw.astype(jnp.float32),
        w_oihw.astype(jnp.float32),
        window_strides=(1, 1),
        padding="SAME",
        dimension_numbers=("NCHW", "OIHW", "NCHW"),
        precision=jax.lax.Precision.HIGHEST,
    ) + b.reshape(1, -1, 1, 1)
    y = pixel_shuffle_nchw(y, scaling_factor)
    return jnp.where(y >= 0, y, alpha * y)


if __name__ == "__main__":
    # Small shapes consistent with the module's forward: (N, n_channels, H, W).
    N, C, H, W = 2, 4, 16, 16
    KSIZE = 3
    SCALE = 2
    COUT = C * SCALE * SCALE

    key = jax.random.PRNGKey(0)
    kx, kwt, kb = jax.random.split(key, 3)

    x = jax.random.normal(kx, (N, C, H, W), dtype=jnp.float32)

    # Deterministic parameter init (Conv2d weight/bias shapes from __init__).
    fan_in = C * KSIZE * KSIZE
    bound = 1.0 / (fan_in ** 0.5)
    w = jax.random.uniform(kwt, (COUT, C, KSIZE, KSIZE), jnp.float32, -bound, bound)
    b = jax.random.uniform(kb, (COUT,), jnp.float32, -bound, bound)
    alpha = jnp.float32(0.25)  # nn.PReLU() default single shared parameter

    out = subpixel_conv_block(x, w, b, alpha, scaling_factor=SCALE)
    out = jax.block_until_ready(out)

    assert out.shape == (N, C, H * SCALE, W * SCALE), out.shape

    ref = _reference(x, w, b, alpha, scaling_factor=SCALE)
    assert jnp.allclose(out, ref, atol=1e-3, rtol=1e-3), float(
        jnp.max(jnp.abs(out - ref))
    )

    print("KERNEL_OK")
</pallas_src>

<mosaic_0001>
module attributes {stable_mosaic.version = 11 : i64} {
  func.func @_conv_prelu_kernel(%arg0: i32, %arg1: memref<1x10x18x4xf32, #tpu.memory_space<vmem>>, %arg2: memref<36x16xf32, #tpu.memory_space<vmem>>, %arg3: memref<1x16xf32, #tpu.memory_space<vmem>>, %arg4: memref<1x1xf32, #tpu.memory_space<smem>>, %arg5: memref<1x8x16x16xf32, #tpu.memory_space<vmem>>) attributes {dimension_semantics = [#tpu.dimension_semantics<parallel>], iteration_bounds = array<i64: 4>, scalar_prefetch = 0 : i64, scratch_operands = 0 : i64, tpu.core_type = #tpu.core_type<tc>, window_params = [{transform_indices = @transform_0, window_bounds = array<i64: 1, 10, 18, 4>}, {pipeline_mode = #tpu.pipeline_mode<synchronous>, transform_indices = @transform_1, window_bounds = array<i64: 36, 16>}, {pipeline_mode = #tpu.pipeline_mode<synchronous>, transform_indices = @transform_2, window_bounds = array<i64: 1, 16>}, {transform_indices = @transform_3, window_bounds = array<i64: 1, 1>}, {transform_indices = @transform_4, window_bounds = array<i64: 1, 8, 16, 16>}]} {
    %c0 = arith.constant 0 : index
    %c0_0 = arith.constant 0 : index
    %c0_1 = arith.constant 0 : index
    %c0_2 = arith.constant 0 : index
    %0 = vector.load %arg1[%c0, %c0_0, %c0_1, %c0_2] : memref<1x10x18x4xf32, #tpu.memory_space<vmem>>, vector<1x10x18x4xf32>
    %1 = vector.shape_cast %0 : vector<1x10x18x4xf32> to vector<10x18x4xf32>
    %2 = vector.extract_strided_slice %1 {offsets = [0, 0, 0], sizes = [8, 16, 4], strides = [1, 1, 1]} : vector<10x18x4xf32> to vector<8x16x4xf32>
    %3 = vector.extract_strided_slice %1 {offsets = [0, 1, 0], sizes = [8, 16, 4], strides = [1, 1, 1]} : vector<10x18x4xf32> to vector<8x16x4xf32>
    %4 = vector.extract_strided_slice %1 {offsets = [0, 2, 0], sizes = [8, 16, 4], strides = [1, 1, 1]} : vector<10x18x4xf32> to vector<8x16x4xf32>
    %5 = vector.extract_strided_slice %1 {offsets = [1, 0, 0], sizes = [8, 16, 4], strides = [1, 1, 1]} : vector<10x18x4xf32> to vector<8x16x4xf32>
    %6 = vector.extract_strided_slice %1 {offsets = [1, 1, 0], sizes = [8, 16, 4], strides = [1, 1, 1]} : vector<10x18x4xf32> to vector<8x16x4xf32>
    %7 = vector.extract_strided_slice %1 {offsets = [1, 2, 0], sizes = [8, 16, 4], strides = [1, 1, 1]} : vector<10x18x4xf32> to vector<8x16x4xf32>
    %8 = vector.extract_strided_slice %1 {offsets = [2, 0, 0], sizes = [8, 16, 4], strides = [1, 1, 1]} : vector<10x18x4xf32> to vector<8x16x4xf32>
    %9 = vector.extract_strided_slice %1 {offsets = [2, 1, 0], sizes = [8, 16, 4], strides = [1, 1, 1]} : vector<10x18x4xf32> to vector<8x16x4xf32>
    %10 = vector.extract_strided_slice %1 {offsets = [2, 2, 0], sizes = [8, 16, 4], strides = [1, 1, 1]} : vector<10x18x4xf32> to vector<8x16x4xf32>
    %11 = tpu.concatenate %2, %3, %4, %5, %6, %7, %8, %9, %10 in 2 : vector<8x16x4xf32>, vector<8x16x4xf32>, vector<8x16x4xf32>, vector<8x16x4xf32>, vector<8x16x4xf32>, vector<8x16x4xf32>, vector<8x16x4xf32>, vector<8x16x4xf32>, vector<8x16x4xf32> -> vector<8x16x36xf32>
    %12 = vector.shape_cast %11 : vector<8x16x36xf32> to vector<128x36xf32>
    %c0_3 = arith.constant 0 : index
    %c0_4 = arith.constant 0 : index
    %13 = vector.load %arg2[%c0_3, %c0_4] : memref<36x16xf32, #tpu.memory_space<vmem>>, vector<36x16xf32>
    %cst = arith.constant dense<0.000000e+00> : vector<128x16xf32>
    %14 = tpu.matmul %12, %13, %cst {dimension_numbers = #tpu.dot_dimension_numbers<[1], [0], [0], [1], [0, 0, 1, 1], [], []>} : vector<128x36xf32>, vector<36x16xf32>, vector<128x16xf32> -> vector<128x16xf32>
    %c0_5 = arith.constant 0 : index
    %c0_6 = arith.constant 0 : index
    %15 = vector.load %arg3[%c0_5, %c0_6] : memref<1x16xf32, #tpu.memory_space<vmem>>, vector<1x16xf32>
    %16 = vector.broadcast %15 : vector<1x16xf32> to vector<128x16xf32>
    %17 = arith.addf %14, %16 : vector<128x16xf32>
    %c0_7 = arith.constant 0 : index
    %c0_8 = arith.constant 0 : index
    %18 = memref.load %arg4[%c0_7, %c0_8] : memref<1x1xf32, #tpu.memory_space<smem>>
    %cst_9 = arith.constant 0.000000e+00 : f32
    %19 = vector.broadcast %cst_9 : f32 to vector<128x16xf32>
    %20 = arith.cmpf oge, %17, %19 : vector<128x16xf32>
    %21 = vector.broadcast %18 : f32 to vector<128x16xf32>
    %22 = arith.mulf %21, %17 : vector<128x16xf32>
    %23 = arith.select %20, %17, %22 : vector<128x16xi1>, vector<128x16xf32>
    %24 = vector.shape_cast %23 : vector<128x16xf32> to vector<1x8x16x16xf32>
    %c0_10 = arith.constant 0 : index
    %c0_11 = arith.constant 0 : index
    %c0_12 = arith.constant 0 : index
    %c0_13 = arith.constant 0 : index
    %25 = vector.load %arg5[%c0_10, %c0_11, %c0_12, %c0_13] : memref<1x8x16x16xf32, #tpu.memory_space<vmem>>, vector<1x8x16x16xf32>
    tpu.vector_store %arg5[%c0_10, %c0_11, %c0_12, %c0_13], %24 {strides = array<i32>} : memref<1x8x16x16xf32, #tpu.memory_space<vmem>>, vector<1x8x16x16xf32>,
    return
  }
  func.func @transform_0(%arg0: i32) -> (i32, i32, i32, i32) {
    %c0_i32 = arith.constant 0 : i32
    %c0_i32_0 = arith.constant 0 : i32
    %c0_i32_1 = arith.constant 0 : i32
    %c0_i32_2 = arith.constant 0 : i32
    return %arg0, %c0_i32, %c0_i32_0, %c0_i32_1 : i32, i32, i32, i32
  }
  func.func @transform_1(%arg0: i32) -> (i32, i32) {
    %c0_i32 = arith.constant 0 : i32
    %c0_i32_0 = arith.constant 0 : i32
    %c0_i32_1 = arith.constant 0 : i32
    return %c0_i32, %c0_i32_0 : i32, i32
  }
  func.func @transform_2(%arg0: i32) -> (i32, i32) {
    %c0_i32 = arith.constant 0 : i32
    %c0_i32_0 = arith.constant 0 : i32
    %c0_i32_1 = arith.constant 0 : i32
    return %c0_i32, %c0_i32_0 : i32, i32
  }
  func.func @transform_3(%arg0: i32) -> (i32, i32) {
    %c0_i32 = arith.constant 0 : i32
    %c0_i32_0 = arith.constant 0 : i32
    %c0_i32_1 = arith.constant 0 : i32
    return %c0_i32, %c0_i32_0 : i32, i32
  }
  func.func @transform_4(%arg0: i32) -> (i32, i32, i32, i32) {
    %c0_i32 = arith.constant 0 : i32
    %c0_i32_0 = arith.constant 0 : i32
    %c0_i32_1 = arith.constant 0 : i32
    %c0_i32_2 = arith.constant 0 : i32
    return %arg0, %c0_i32, %c0_i32_0, %c0_i32_1 : i32, i32, i32, i32
  }
}

</mosaic_0001>

<bundles_post_ra>
// kernel: tpu_custom_call.1
= control target key start
LH: loop header
LB: loop body
LE: loop exit
PB: predicated region body
PF: predicated region fallthrough
CT: control target
= control target key end

     0   :  { %s2306_s0 = inlined_call_operand.vmem [shape: f32[4,10,18,4], index: 0, kind: input, shape index: {}]   ;;  %s2307_s1 = inlined_call_operand.vmem [shape: f32[36,16], index: 1, kind: input, shape index: {}]   ;;  %s2308_s2 = inlined_call_operand.vmem [shape: f32[1,16], index: 2, kind: input, shape index: {}]   ;;  %s2309_s3 = inlined_call_operand.<no memory space> [shape: f32[1,1], index: 3, kind: input, shape index: {}]   ;;  %s2310_s4 = inlined_call_operand.hbm [shape: f32[4,8,16,16], index: 4, kind: output, shape index: {}]  }
   0x1   :  { %9 = sst [smem:[#allocation2]] %s2309_s3 }
   0x2   :  { %10 = vsyncpa [#allocation4], 0 }
   0x3   :  { %12 = vsyncpa [#allocation4 + $0x1], 0  ;;  %s1481_s17 = smov 0   ;;  %s1483_s18 = smov 0  }
   0x4   :  { %s1485_s19 = smov 0   ;;  %s1487_s20 = smov 0  }
   0x5 LB: > { %s1502_s3 = sadd.s32 4294967295, %s1441_s20   ;;  %s1231_s21 = sadd.s32 4294967294, %s1441_s20   ;;  %s1441_s20 = sphi %s1487_s20, %s2343_s20   ;;  %s1437_s19 = sphi %s1485_s19, %s2342_s19   ;;  %s1433_s18 = sphi %s1483_s18, %s2341_s18   ;;  %s1429_s17 = sphi %s1481_s17, %s2340_s17  }
   0x6   : > { %s1506_s22 = sadd.s32 1, %s1441_s20   ;;  %s114_s23 = sadd.s32 1, %s1437_s19 }
   0x7   : > { %s111_s24 = ssub.s32 %s1441_s20, %s1506_s22  ;;  %p124_p0 = scmp.ne.s32.totalorder %s1437_s19, %s1433_s18 }
   0x8   : > { %p112_p1 = scmp.eq.s32.totalorder %s111_s24, 0  ;;  %p125_p2 = scmp.eq.s32.totalorder %s1502_s3, 3 }
   0x9   : > { %p130_p3 = scmp.ne.s32.totalorder %s1433_s18, %s1429_s17  ;;  %p131_p4 = scmp.eq.s32.totalorder %s1231_s21, 3 }
   0xa   : > { %s1517_s25 = scalar_select %p112_p1, %s1437_s19, %s114_s23  }
   0xb   : > { %p1519_p5 = por %p125_p2, %p124_p0  ;;  %p1523_p6 = por %p131_p4, %p130_p3 }
   0xc   : > { %p1234_p7 = scmp.ge.s32.totalorder %s1441_s20, 1  ;;  %p166_p8 = scmp.lt.s32.totalorder %s1441_s20, 5 }
   0xe   : > { %p167_p9 = pnand %p1234_p7, %p166_p8 }
  0x10   : > { %170 = sbr.rel (%p167_p9) target bundleno = 636 (0x27c), region = 36 }
  0x17   : > { %p192_p10 = scmp.lt.s32.totalorder %s1502_s3, 3  ;;  %vm251_vm0 = vcmask 1046528   ;;  %s1443_s7 = smov 4   ;;  %vm340_vm1 = vcmask 1045504   ;;  %vm940_vm2 = vcmask 1043456   ;;  %vm743_vm3 = vcmask 31744  }
  0x18   : > { %s1444_s8 = smov 8   ;;  %s1445_s9 = smov 12   ;;  %vm760_vm4 = vcmask 64512   ;;  %vm777_vm5 = vcmask 97280   ;;  %vm794_vm6 = vcmask 130048   ;;  %vm811_vm7 = vcmask 162816  }
  0x19   : > { %s193_s28 = scalar_select %p192_p10, %s1502_s3, 3  ;;  %vm828_vm8 = vcmask 195584   ;;  %vm845_vm9 = vcmask 228352   ;;  %vm862_vm10 = vcmask 261120   ;;  %vm891_vm11 = vcmask 293888  }
  0x1a   : > { %s1446_s10 = smov 16   ;;  %s1447_s11 = smov 20  }
  0x1b   : > { %s1330_s29 = smul.u32 240, %s193_s28  ;;  %s1448_s12 = smov 24  }
  0x1c   : > { %s1449_s13 = smov 28   ;;  %s1450_s30 = smov 32  }
  0x1d   : > { %s1534_s6 = scalar_lea.vmem %s2306_s0, %s1330_s29  ;;  %s1451_s28 = smov [#allocation3]  }
  0x1e   : > { %v1537_v0 = vld [vmem:[%s1534_s6 + $0x8] sm:$0xff]  ;;  %v199_v1 = vld [vmem:[%s1534_s6 + $0x10] sm:$0x3]  ;;  %v1541_v2 = vld [vmem:[%s1534_s6] sm:$0xff]  ;;  %s1383_s29 = sshll.u32 %s1451_s28, 4  ;;  %s1384_s29 = int_to_ptr.vmem [resolvable:$false] %s1383_s29 }
  0x1f   : > { %v253_v3 = vrot.slane %v1537_v0, 1  ;;  %v255_v4 = vrot.slane %v199_v1, 1  ;;  %v252_v5 = vrot.slane %v1541_v2, 1  ;;  %v1546_v6 = vld [vmem:[%s1534_s6 + $0x68] sm:$0xff]  ;;  %v211_v7 = vld [vmem:[%s1534_s6 + $0x70] sm:$0x3] }
  0x20   : > { %v273_v8 = vrot.slane %v1546_v6, 1  ;;  %v275_v9 = vrot.slane %v211_v7, 1  ;;  %v1551_v10 = vld [vmem:[%s1534_s6 + $0x60] sm:$0xff]  ;;  %v362_v14 = vrot.slane %v1546_v6, 2  ;;  %v341_v15 = vrot.slane %v1541_v2, 2  ;;  %v1587_v26 = vld [vmem:[%s1534_s6 + $0x78] sm:$0xff] }
  0x21   : > { %v256_v11 = vsel %vm251_vm0, %v253_v3, %v255_v4  ;;  %v254_v12 = vsel %vm251_vm0, %v252_v5, %v253_v3  ;;  %v272_v13 = vrot.slane %v1551_v10, 1  ;;  %v361_v18 = vrot.slane %v1551_v10, 2  ;;  %v1590_v27 = vld [vmem:[%s1534_s6 + $0x18] sm:$0xff]  ;;  %v1593_v28 = vld [vmem:[%s1534_s6 + $0x80] sm:$0xff]  ;;  %v214_v36 = vld [vmem:[%s1534_s6 + $0x88] sm:$0x3] }
  0x22   : > { %294 = vrot.lane.b32.xlu1 %v256_v11, %s1443_s7  ;;  %292 = vrot.lane.b32.xlu0 %v254_v12, %s1443_s7  ;;  %v1561_v16 = vsel %vm251_vm0, %v273_v8, %v275_v9  ;;  %v342_v19 = vrot.slane %v1537_v0, 2  ;;  %v364_v22 = vrot.slane %v211_v7, 2  ;;  %v344_v23 = vrot.slane %v199_v1, 2  ;;  %v1596_v29 = vld [vmem:[%s1534_s6 + $0x20] sm:$0xff]  ;;  %v202_v37 = vld [vmem:[%s1534_s6 + $0x28] sm:$0x3] }
  0x23   : > { %v1564_v17 = vsel %vm251_vm0, %v272_v13, %v273_v8  ;;  %v1573_v20 = vsel %vm340_vm1, %v361_v18, %v362_v14  ;;  %v277_v30 = vrot.slane %v1587_v26, 1  ;;  %v278_v31 = vrot.slane %v1593_v28, 1  ;;  %v1654_v52 = vld [vmem:[%s1534_s6 + $0x90] sm:$0xff]  ;;  %v1667_v54 = vld [vmem:[%s1534_s6 + $0x98] sm:$0xff]  ;;  %v217_v62 = vld [vmem:[%s1534_s6 + $0xa0] sm:$0x3] }
  0x24   : > { %v343_v21 = vsel %vm340_vm1, %v341_v15, %v342_v19  ;;  %v1580_v24 = vsel %vm340_vm1, %v362_v14, %v364_v22  ;;  %v345_v25 = vsel %vm340_vm1, %v342_v19, %v344_v23  ;;  %v257_v32 = vrot.slane %v1590_v27, 1  ;;  %v1657_v53 = vld [vmem:[%s1534_s6 + $0x30] sm:$0xff]  ;;  %v1670_v55 = vld [vmem:[%s1534_s6 + $0x38] sm:$0xff]  ;;  %v205_v63 = vld [vmem:[%s1534_s6 + $0x40] sm:$0x3] }
  0x25   : > { %v258_v33 = vrot.slane %v1596_v29, 1  ;;  %v1611_v34 = vsel %vm251_vm0, %v277_v30, %v278_v31  ;;  %v280_v38 = vrot.slane %v214_v36, 1  ;;  %v260_v39 = vrot.slane %v202_v37, 1  ;;  %2326 = vst [vmem:[#allocation10_spill] sm:$0xff] %v1670_v55  ;;  %v879_v8 = vld [vmem:[%s2307_s1] sm:$0xff]  ;;  %v880_v9 = vld [vmem:[%s2307_s1 + $0x8] sm:$0xff] }
  0x26   : > { %310 = vrot.lane.b32.xlu1 %v1561_v16, %s1443_s7  ;;  %308 = vrot.lane.b32.xlu0 %v1564_v17, %s1443_s7  ;;  %2322 = vst [vmem:[#allocation6_spill] sm:$0xff] %v1611_v34  ;;  %v366_v40 = vrot.slane %v1587_v26, 2  ;;  %v367_v41 = vrot.slane %v1593_v28, 2  ;;  %v346_v44 = vrot.slane %v1590_v27, 2  ;;  %v347_v45 = vrot.slane %v1596_v29, 2  ;;  %v881_v15 = vld [vmem:[%s2307_s1 + $0x10] sm:$0xff] }
  0x27   : > { %v259_v35 = vsel %vm251_vm0, %v257_v32, %v258_v33  ;;  %v1625_v42 = vsel %vm251_vm0, %v278_v31, %v280_v38  ;;  %v261_v43 = vsel %vm251_vm0, %v258_v33, %v260_v39  ;;  %v369_v48 = vrot.slane %v214_v36, 2  ;;  %v882_v18 = vld [vmem:[%s2307_s1 + $0x18] sm:$0xff]  ;;  %v883_v23 = vld [vmem:[%s2307_s1 + $0x20] sm:$0xf]  ;;  %v1740_v33 = vld [vmem:[%s1534_s6 + $0xa8] sm:$0xff] }
  0x28   : > { %2323 = vst [vmem:[#allocation7_spill] sm:$0xff] %v1625_v42  ;;  %v1634_v46 = vsel %vm340_vm1, %v366_v40, %v367_v41  ;;  %v348_v47 = vsel %vm340_vm1, %v346_v44, %v347_v45  ;;  %v349_v49 = vrot.slane %v202_v37, 2  ;;  %v282_v56 = vrot.slane %v1654_v52, 1  ;;  %2327 = vst [vmem:[#allocation11_spill] sm:$0xff] %v1740_v33  ;;  %v1767_v44 = vld [vmem:[%s1534_s6 + $0x50] sm:$0xff] }
  0x29   : > { %2324 = vst [vmem:[#allocation8_spill] sm:$0xff] %v1634_v46  ;;  %v1647_v50 = vsel %vm340_vm1, %v367_v41, %v369_v48  ;;  %v283_v57 = vrot.slane %v1667_v54, 1  ;;  %v262_v58 = vrot.slane %v1657_v53, 1  ;;  %v263_v59 = vrot.slane %v1670_v55, 1  ;;  %2330 = vst [vmem:[#allocation14_spill] sm:$0xff] %v1767_v44 }
  0x2a   : > { %397 = vrot.lane.b32.xlu1 %v1573_v20, %s1444_s8  ;;  %381 = vrot.lane.b32.xlu0 %v343_v21, %s1444_s8  ;;  %2325 = vst [vmem:[#allocation9_spill] sm:$0xff] %v1647_v50  ;;  %v350_v51 = vsel %vm340_vm1, %v347_v45, %v349_v49  ;;  %v285_v1 = vrot.slane %v217_v62, 1  ;;  %v265_v3 = vrot.slane %v205_v63, 1  ;;  %v371_v4 = vrot.slane %v1654_v52, 2 }
  0x2b   : > { %v284_v60 = vsel %vm251_vm0, %v282_v56, %v283_v57  ;;  %v264_v61 = vsel %vm251_vm0, %v262_v58, %v263_v59  ;;  %v372_v5 = vrot.slane %v1667_v54, 2  ;;  %v351_v7 = vrot.slane %v1657_v53, 2 }
  0x2c   : > { %v286_v11 = vsel %vm251_vm0, %v283_v57, %v285_v1  ;;  %v266_v12 = vsel %vm251_vm0, %v263_v59, %v265_v3  ;;  %v352_v13 = vrot.slane %v1670_v55, 2  ;;  %v1316_v14 = vpack.c.bf16 %v880_v9, %v879_v8 }
  0x2d   : > { %v373_v19 = vsel %vm340_vm1, %v371_v4, %v372_v5  ;;  %v1320_v22 = vpack.c.bf16 %v882_v18, %v881_v15  ;;  %v354_v30 = vrot.slane %v205_v63, 2  ;;  %v287_v45 = vrot.slane %v1740_v33, 1 }
  0x2e   : > { %399 = vrot.lane.b32.xlu1 %v1580_v24, %s1444_s8  ;;  %383 = vrot.lane.b32.xlu0 %v345_v25, %s1444_s8  ;;  %v353_v21 = vsel %vm340_vm1, %v351_v7, %v352_v13  ;;  %v374_v25 = vrot.slane %v217_v62, 2  ;;  %v268_v49 = vrot.slane %v1767_v44, 1  ;;  %v208_v62 = vld [vmem:[%s1534_s6 + $0x58] sm:$0x3] }
  0x2f   : > { %1317 = vmatprep.subr.bf16.mxu0 %v1316_v14  ;;  %1324 = vmatprep.subr.bf16.mxu1 %v1316_v14  ;;  %v355_v32 = vsel %vm340_vm1, %v352_v13, %v354_v30  ;;  %v270_v4 = vrot.slane %v208_v62, 1 }
  0x30   : > { %1319 = vmatpush3.bf16.msra.mxu0 %v1316_v14  ;;  %1327 = vmatpush3.bf16.msra.mxu1 %v1316_v14  ;;  %v375_v31 = vsel %vm340_vm1, %v372_v5, %v374_v25  ;;  %v357_v14 = vrot.slane %v1767_v44, 2 }
  0x31   : > { %1321 = vmatprep.subr.bf16.mxu0 %v1320_v22  ;;  %1325 = vmatprep.subr.bf16.mxu1 %v1320_v22  ;;  %v271_v9 = vsel %vm251_vm0, %v268_v49, %v270_v4 }
  0x32   : > { %447 = vrot.lane.b32.xlu1 %v1587_v26, %s1445_s9  ;;  %431 = vrot.lane.b32.xlu0 %v1590_v27, %s1445_s9 }
  0x34   : > { %1323 = vmatpush3.bf16.msra.mxu0 %v1320_v22  ;;  %1328 = vmatpush3.bf16.msra.mxu1 %v1320_v22 }
  0x35   : > { %1290 = vmatprep.subr.msk.mxu0 %vm940_vm2, %v883_v23  ;;  %1326 = vmatprep.subr.msk.mxu1 %vm940_vm2, %v883_v23 }
  0x36   : > { %449 = vrot.lane.b32.xlu1 %v1593_v28, %s1445_s9  ;;  %433 = vrot.lane.b32.xlu0 %v1596_v29, %s1445_s9 }
  0x38   : > { %1291 = vmatpush3.msk.msra.mxu0 %vm940_vm2, %v883_v23  ;;  %1329 = vmatpush3.msk.msra.mxu1 %vm940_vm2, %v883_v23 }
  0x3a   : > { %501 = vrot.lane.b32.xlu1 %v1611_v34, %s1446_s10  ;;  %485 = vrot.lane.b32.xlu0 %v259_v35, %s1446_s10 }
  0x3e   : > { %312 = vrot.lane.b32.xlu1 %v1611_v34, %s1443_s7  ;;  %296 = vrot.lane.b32.xlu0 %v259_v35, %s1443_s7  ;;  %v1743_v35 = vld [vmem:[%s1534_s6 + $0x48] sm:$0xff] }
  0x3f   : > { %2328 = vst [vmem:[#allocation12_spill] sm:$0xff] %v1743_v35  ;;  %v267_v48 = vrot.slane %v1743_v35, 1  ;;  %v356_v13 = vrot.slane %v1743_v35, 2 }
  0x41   : > { %v269_v58 = vsel %vm251_vm0, %v267_v48, %v268_v49 }
  0x42   : > { %503 = vrot.lane.b32.xlu1 %v1625_v42, %s1446_s10  ;;  %487 = vrot.lane.b32.xlu0 %v261_v43, %s1446_s10 }
  0x46   : > { %554 = vrot.lane.b32.xlu1 %v1634_v46, %s1447_s11  ;;  %538 = vrot.lane.b32.xlu0 %v348_v47, %s1447_s11 }
  0x4a   : > { %314 = vrot.lane.b32.xlu1 %v1625_v42, %s1443_s7  ;;  %298 = vrot.lane.b32.xlu0 %v261_v43, %s1443_s7  ;;  %v1764_v43 = vld [vmem:[%s1534_s6 + $0xb0] sm:$0xff] }
  0x4b   : > { %2329 = vst [vmem:[#allocation13_spill] sm:$0xff] %v1764_v43 }
  0x4e   : > { %401 = vrot.lane.b32.xlu1 %v1634_v46, %s1444_s8  ;;  %385 = vrot.lane.b32.xlu0 %v348_v47, %s1444_s8  ;;  %v288_v47 = vrot.slane %v1764_v43, 1 }
  0x50   : > { %v289_v57 = vsel %vm251_vm0, %v287_v45, %v288_v47 }
  0x52   : > { %556 = vrot.lane.b32.xlu1 %v1647_v50, %s1447_s11  ;;  %540 = vrot.lane.b32.xlu0 %v350_v51, %s1447_s11 }
  0x56   : > { %604 = vrot.lane.b32.xlu1 %v1654_v52, %s1448_s12  ;;  %588 = vrot.lane.b32.xlu0 %v1657_v53, %s1448_s12 }
  0x5a   : > { %403 = vrot.lane.b32.xlu1 %v1647_v50, %s1444_s8  ;;  %387 = vrot.lane.b32.xlu0 %v350_v51, %s1444_s8 }
  0x5e   : > { %451 = vrot.lane.b32.xlu1 %v1654_v52, %s1445_s9  ;;  %435 = vrot.lane.b32.xlu0 %v1657_v53, %s1445_s9 }
  0x62   : > { %606 = vrot.lane.b32.xlu1 %v1667_v54, %s1448_s12  ;;  %590 = vrot.lane.b32.xlu0 %v1670_v55, %s1448_s12 }
  0x66   : > { %658 = vrot.lane.b32.xlu1 %v284_v60, %s1449_s13  ;;  %642 = vrot.lane.b32.xlu0 %v264_v61, %s1449_s13 }
  0x6a   : > { %453 = vrot.lane.b32.xlu1 %v1667_v54, %s1445_s9  ;;  %437 = vrot.lane.b32.xlu0 %v1670_v55, %s1445_s9 }
  0x6e   : > { %505 = vrot.lane.b32.xlu1 %v284_v60, %s1446_s10  ;;  %489 = vrot.lane.b32.xlu0 %v264_v61, %s1446_s10 }
  0x72   : > { %660 = vrot.lane.b32.xlu1 %v286_v11, %s1449_s13  ;;  %644 = vrot.lane.b32.xlu0 %v266_v12, %s1449_s13 }
  0x76   : > { %711 = vrot.lane.b32.xlu1 %v373_v19, %s1450_s30  ;;  %695 = vrot.lane.b32.xlu0 %v353_v21, %s1450_s30 }
  0x7a   : > { %316 = vrot.lane.b32.xlu1 %v284_v60, %s1443_s7  ;;  %300 = vrot.lane.b32.xlu0 %v264_v61, %s1443_s7  ;;  %v220_v61 = vld [vmem:[%s1534_s6 + $0xb8] sm:$0x3] }
  0x7b   : > { %v290_v3 = vrot.slane %v220_v61, 1  ;;  %v379_v45 = vrot.slane %v220_v61, 2 }
  0x7d   : > { %v291_v8 = vsel %vm251_vm0, %v288_v47, %v290_v3  ;;  %v359_v47 = vrot.slane %v208_v62, 2 }
  0x7e   : > { %507 = vrot.lane.b32.xlu1 %v286_v11, %s1446_s10  ;;  %491 = vrot.lane.b32.xlu0 %v266_v12, %s1446_s10 }
  0x82   : > { %558 = vrot.lane.b32.xlu1 %v373_v19, %s1447_s11  ;;  %542 = vrot.lane.b32.xlu0 %v353_v21, %s1447_s11 }
  0x86   : > { %713 = vrot.lane.b32.xlu1 %v375_v31, %s1450_s30  ;;  %697 = vrot.lane.b32.xlu0 %v355_v32, %s1450_s30 }
  0x8a   : > { %318 = vrot.lane.b32.xlu1 %v286_v11, %s1443_s7  ;;  %302 = vrot.lane.b32.xlu0 %v266_v12, %s1443_s7  ;;  %v376_v11 = vrot.slane %v1740_v33, 2  ;;  %v377_v12 = vrot.slane %v1764_v43, 2 }
  0x8e   : > { %405 = vrot.lane.b32.xlu1 %v373_v19, %s1444_s8  ;;  %389 = vrot.lane.b32.xlu0 %v353_v21, %s1444_s8  ;;  %v378_v19 = vsel %vm340_vm1, %v376_v11, %v377_v12  ;;  %v358_v21 = vsel %vm340_vm1, %v356_v13, %v357_v14 }
  0x92   : > { %560 = vrot.lane.b32.xlu1 %v375_v31, %s1447_s11  ;;  %544 = vrot.lane.b32.xlu0 %v355_v32, %s1447_s11 }
  0x94   : > { %v1745_v36 = vpop.permute.xlu1 %294  ;;  %v1747_v37 = vpop.permute.xlu0 %292 }
  0x96   : > { %608 = vrot.lane.b32.xlu1 %v1740_v33, %s1448_s12  ;;  %592 = vrot.lane.b32.xlu0 %v1743_v35, %s1448_s12 }
  0x98   : > { %v1753_v38 = vpop.permute.xlu1 %310  ;;  %v1755_v39 = vpop.permute.xlu0 %308 }
  0x9a   : > { %407 = vrot.lane.b32.xlu1 %v375_v31, %s1444_s8  ;;  %391 = vrot.lane.b32.xlu0 %v355_v32, %s1444_s8 }
  0x9c   : > { %v1759_v40 = vpop.permute.xlu1 %397  ;;  %v1761_v41 = vpop.permute.xlu0 %381 }
  0x9e   : > { %455 = vrot.lane.b32.xlu1 %v1740_v33, %s1445_s9  ;;  %439 = vrot.lane.b32.xlu0 %v1743_v35, %s1445_s9 }
  0xa0   : > { %v1777_v51 = vpop.permute.xlu1 %399  ;;  %v1779_v56 = vpop.permute.xlu0 %383 }
  0xa2   : > { %610 = vrot.lane.b32.xlu1 %v1764_v43, %s1448_s12  ;;  %594 = vrot.lane.b32.xlu0 %v1767_v44, %s1448_s12 }
  0xa4   : > { %v1787_v59 = vpop.permute.xlu1 %447  ;;  %v1789_v60 = vpop.permute.xlu0 %431 }
  0xa6   : > { %662 = vrot.lane.b32.xlu1 %v289_v57, %s1449_s13  ;;  %646 = vrot.lane.b32.xlu0 %v269_v58, %s1449_s13 }
  0xa8   : > { %v1795_v63 = vpop.permute.xlu1 %449  ;;  %v1797_v1 = vpop.permute.xlu0 %433 }
  0xaa   : > { %457 = vrot.lane.b32.xlu1 %v1764_v43, %s1445_s9  ;;  %441 = vrot.lane.b32.xlu0 %v1767_v44, %s1445_s9  ;;  %v1879_v43 = vld [vmem:[%s1534_s6 + $0xc8] sm:$0xff] }
  0xab   : > { %v481_v46 = vrot.slane %v1879_v43, 1 }
  0xac   : > { %v1803_v5 = vpop.permute.xlu1 %501  ;;  %v1805_v7 = vpop.permute.xlu0 %485 }
  0xae   : > { %509 = vrot.lane.b32.xlu1 %v289_v57, %s1446_s10  ;;  %493 = vrot.lane.b32.xlu0 %v269_v58, %s1446_s10 }
  0xb0   : > { %v313_v15 = vpop.permute.xlu1 %312  ;;  %v297_v18 = vpop.permute.xlu0 %296 }
  0xb1   : > { %v754_v35 = vsel %vm743_vm3, %v1587_v26, %v313_v15  ;;  %v746_v33 = vsel %vm743_vm3, %v1590_v27, %v297_v18 }
  0xb2   : > { %664 = vrot.lane.b32.xlu1 %v291_v8, %s1449_s13  ;;  %648 = vrot.lane.b32.xlu0 %v271_v9, %s1449_s13 }
  0xb4   : > { %v1819_v22 = vpop.permute.xlu1 %503  ;;  %v1821_v23 = vpop.permute.xlu0 %487 }
  0xb6   : > { %715 = vrot.lane.b32.xlu1 %v378_v19, %s1450_s30  ;;  %699 = vrot.lane.b32.xlu0 %v358_v21, %s1450_s30 }
  0xb8   : > { %v1825_v25 = vpop.permute.xlu1 %554  ;;  %v1827_v30 = vpop.permute.xlu0 %538 }
  0xba   : > { %320 = vrot.lane.b32.xlu1 %v289_v57, %s1443_s7  ;;  %304 = vrot.lane.b32.xlu0 %v269_v58, %s1443_s7  ;;  %v380_v57 = vsel %vm340_vm1, %v377_v12, %v379_v45  ;;  %v360_v58 = vsel %vm340_vm1, %v357_v14, %v359_v47  ;;  %v1862_v45 = vld [vmem:[%s1534_s6 + $0xc0] sm:$0xff] }
  0xbb   : > { %v480_v50 = vrot.slane %v1862_v45, 1 }
  0xbc   : > { %v1831_v31 = vpop.permute.xlu1 %314  ;;  %v1833_v32 = vpop.permute.xlu0 %298 }
  0xbe   : > { %511 = vrot.lane.b32.xlu1 %v291_v8, %s1446_s10  ;;  %495 = vrot.lane.b32.xlu0 %v271_v9, %s1446_s10 }
  0xc0   : > { %v402_v48 = vpop.permute.xlu1 %401  ;;  %v386_v49 = vpop.permute.xlu0 %385 }
  0xc2   : > { %562 = vrot.lane.b32.xlu1 %v378_v19, %s1447_s11  ;;  %546 = vrot.lane.b32.xlu0 %v358_v21, %s1447_s11 }
  0xc4   : > { %v1841_v3 = vpop.permute.xlu1 %556  ;;  %v1843_v4 = vpop.permute.xlu0 %540 }
  0xc6   : > { %717 = vrot.lane.b32.xlu1 %v380_v57, %s1450_s30  ;;  %701 = vrot.lane.b32.xlu0 %v360_v58, %s1450_s30 }
  0xc8   : > { %v1847_v61 = vpop.permute.xlu1 %604  ;;  %v1849_v62 = vpop.permute.xlu0 %588 }
  0xca   : > { %322 = vrot.lane.b32.xlu1 %v291_v8, %s1443_s7  ;;  %306 = vrot.lane.b32.xlu0 %v271_v9, %s1443_s7  ;;  %s189_s7 = sand.u32 1, %s1433_s18  }
  0xcb   : > { %s2264_s23 = scalar_lea.sflag [#allocation4], %s189_s7 }
  0xcc   : > { %v1853_v11 = vpop.permute.xlu1 %403  ;;  %v1855_v12 = vpop.permute.xlu0 %387 }
  0xce   : > { %409 = vrot.lane.b32.xlu1 %v378_v19, %s1444_s8  ;;  %393 = vrot.lane.b32.xlu0 %v358_v21, %s1444_s8 }
  0xd0   : > { %v452_v13 = vpop.permute.xlu1 %451  ;;  %v436_v14 = vpop.permute.xlu0 %435 }
  0xd2   : > { %564 = vrot.lane.b32.xlu1 %v380_v57, %s1447_s11  ;;  %548 = vrot.lane.b32.xlu0 %v360_v58, %s1447_s11 }
  0xd4   : > { %v1864_v8 = vpop.permute.xlu1 %606  ;;  %v1866_v9 = vpop.permute.xlu0 %590 }
  0xd6   : > { %612 = vrot.lane.b32.xlu1 %v1862_v45, %s1448_s12  ;;  %596 = vrot.lane.b32.xlu0 %v1551_v10, %s1448_s12 }
  0xd8   : > { %v659_v19 = vpop.permute.xlu1 %658  ;;  %v643_v21 = vpop.permute.xlu0 %642 }
  0xda   : > { %411 = vrot.lane.b32.xlu1 %v380_v57, %s1444_s8  ;;  %395 = vrot.lane.b32.xlu0 %v360_v58, %s1444_s8  ;;  %v771_v57 = vsel %vm760_vm4, %v754_v35, %v402_v48  ;;  %v763_v58 = vsel %vm760_vm4, %v746_v33, %v386_v49  ;;  %v744_v33 = vsel %vm743_vm3, %v1541_v2, %v1747_v37 }
  0xdb   : > { %v788_v15 = vsel %vm777_vm5, %v771_v57, %v452_v13  ;;  %v780_v42 = vsel %vm777_vm5, %v763_v58, %v436_v14  ;;  %v752_v35 = vsel %vm743_vm3, %v1551_v10, %v1755_v39  ;;  %v482_v49 = vsel %vm251_vm0, %v480_v50, %v481_v46 }
  0xdc   : > { %v1874_v47 = vpop.permute.xlu1 %453  ;;  %v1876_v44 = vpop.permute.xlu0 %437  ;;  %v769_v48 = vsel %vm760_vm4, %v752_v35, %v1759_v40  ;;  %v534_v35 = vrot.slane %v1879_v43, 2 }
  0xdd   : > { %v786_v2 = vsel %vm777_vm5, %v769_v48, %v1787_v59 }
  0xde   : > { %459 = vrot.lane.b32.xlu1 %v1862_v45, %s1445_s9  ;;  %443 = vrot.lane.b32.xlu0 %v1551_v10, %s1445_s9  ;;  %v803_v13 = vsel %vm794_vm6, %v786_v2, %v1803_v5 }
  0xdf   : > { %v820_v50 = vsel %vm811_vm7, %v803_v13, %v1825_v25 }
  0xe0   : > { %v506_v27 = vpop.permute.xlu1 %505  ;;  %v490_v18 = vpop.permute.xlu0 %489  ;;  %v837_v59 = vsel %vm828_vm8, %v820_v50, %v1847_v61 }
  0xe1   : > { %v1896_v34 = vsel %vm794_vm6, %v788_v15, %v506_v27  ;;  %v1899_v55 = vsel %vm794_vm6, %v780_v42, %v490_v18  ;;  %v761_v42 = vsel %vm760_vm4, %v744_v33, %v1761_v41  ;;  %v854_v5 = vsel %vm845_vm9, %v837_v59, %v659_v19 }
  0xe2   : > { %614 = vrot.lane.b32.xlu1 %v1879_v43, %s1448_s12  ;;  %598 = vrot.lane.b32.xlu0 %v1546_v6, %s1448_s12  ;;  %v778_v10 = vsel %vm777_vm5, %v761_v42, %v1789_v60  ;;  %v747_v15 = vsel %vm743_vm3, %v1596_v29, %v1833_v32  ;;  %v533_v27 = vrot.slane %v1862_v45, 2 }
  0xe3   : > { %v795_v40 = vsel %vm794_vm6, %v778_v10, %v1805_v7  ;;  %v764_v33 = vsel %vm760_vm4, %v747_v15, %v1855_v12 }
  0xe4   : > { %v661_v37 = vpop.permute.xlu1 %660  ;;  %v645_v39 = vpop.permute.xlu0 %644  ;;  %v812_v41 = vsel %vm811_vm7, %v795_v40, %v1827_v30  ;;  %v223_v30 = vld [vmem:[%s1534_s6 + $0xd0] sm:$0x3]  ;;  %v781_v32 = vsel %vm777_vm5, %v764_v33, %v1876_v44 }
  0xe5   : > { %v829_v60 = vsel %vm828_vm8, %v812_v41, %v1849_v62  ;;  %v483_v61 = vrot.slane %v223_v30, 1 }
  0xe6   : > { %666 = vrot.lane.b32.xlu1 %v482_v49, %s1449_s13  ;;  %650 = vrot.lane.b32.xlu0 %v1564_v17, %s1449_s13  ;;  %v846_v7 = vsel %vm845_vm9, %v829_v60, %v643_v21  ;;  %v755_v21 = vsel %vm743_vm3, %v1593_v28, %v1831_v31 }
  0xe7   : > { %v772_v18 = vsel %vm760_vm4, %v755_v21, %v1853_v11  ;;  %v484_v31 = vsel %vm251_vm0, %v481_v46, %v483_v61  ;;  %v753_v46 = vsel %vm743_vm3, %v1546_v6, %v1753_v38 }
  0xe8   : > { %v712_v25 = vpop.permute.xlu1 %711  ;;  %v696_v14 = vpop.permute.xlu0 %695  ;;  %v789_v29 = vsel %vm777_vm5, %v772_v18, %v1874_v47  ;;  %v535_v47 = vsel %vm340_vm1, %v533_v27, %v534_v35 }
  0xe9   : > { %v871_v57 = vsel %vm862_vm10, %v854_v5, %v712_v25  ;;  %v863_v58 = vsel %vm862_vm10, %v846_v7, %v696_v14  ;;  %v225_v7 = vld [vmem:[%s1534_s6 + $0xe0] sm:$0xff] }
  0xea   : > { %461 = vrot.lane.b32.xlu1 %v1879_v43, %s1445_s9  ;;  %1304 = vmatprep.mubr.msk.f32.mxu1 %vm891_vm11, %v871_v57  ;;  %v770_v43 = vsel %vm760_vm4, %v753_v46, %v1777_v51  ;;  %v638_v14 = vrot.slane %v225_v7, 1  ;;  %v2331_v57 = vld [vmem:[#allocation10_spill] sm:$0xff] }
  0xeb   : > { %445 = vrot.lane.b32.xlu0 %v1546_v6, %s1445_s9  ;;  %1292 = vmatprep.mubr.msk.f32.mxu0 %vm891_vm11, %v863_v58 }
  0xec   : > { %v317_v62 = vpop.permute.xlu1 %316  ;;  %v301_v19 = vpop.permute.xlu0 %300 }
  0xed   : > { %v756_v13 = vsel %vm743_vm3, %v1654_v52, %v317_v62  ;;  %v224_v52 = vld [vmem:[%s1534_s6 + $0xd8] sm:$0xff] }
  0xee   : > { %513 = vrot.lane.b32.xlu1 %v482_v49, %s1446_s10  ;;  %v637_v25 = vrot.slane %v224_v52, 1 }
  0xef   : > { %497 = vrot.lane.b32.xlu0 %v1564_v17, %s1446_s10  ;;  %v745_v17 = vsel %vm743_vm3, %v1537_v0, %v1745_v36  ;;  %v787_v0 = vsel %vm777_vm5, %v770_v43, %v1795_v63 }
  0xf0   : > { %v508_v45 = vpop.permute.xlu1 %507  ;;  %v492_v48 = vpop.permute.xlu0 %491  ;;  %v762_v44 = vsel %vm760_vm4, %v745_v17, %v1779_v56  ;;  %v804_v51 = vsel %vm794_vm6, %v787_v0, %v1819_v22 }
  0xf1   : > { %v1967_v11 = vsel %vm794_vm6, %v789_v29, %v508_v45  ;;  %v1970_v12 = vsel %vm794_vm6, %v781_v32, %v492_v48  ;;  %v779_v36 = vsel %vm777_vm5, %v762_v44, %v1797_v1  ;;  %v821_v42 = vsel %vm811_vm7, %v804_v51, %v1841_v3  ;;  %v2332_v29 = vld [vmem:[#allocation6_spill] sm:$0xff]  ;;  %v2333_v48 = vld [vmem:[#allocation7_spill] sm:$0xff] }
  0xf2   : > { %668 = vrot.lane.b32.xlu1 %v484_v31, %s1449_s13  ;;  %v796_v56 = vsel %vm794_vm6, %v779_v36, %v1821_v23  ;;  %v838_v63 = vsel %vm828_vm8, %v821_v42, %v1864_v8  ;;  %v536_v8 = vrot.slane %v223_v30, 2 }
  0xf3   : > { %652 = vrot.lane.b32.xlu0 %v1561_v16, %s1449_s13  ;;  %v813_v49 = vsel %vm811_vm7, %v796_v56, %v1843_v4  ;;  %v855_v22 = vsel %vm845_vm9, %v838_v63, %v661_v37 }
  0xf4   : > { %v1990_v6 = vpop.permute.xlu1 %558  ;;  %v1992_v38 = vpop.permute.xlu0 %542  ;;  %v830_v1 = vsel %vm828_vm8, %v813_v49, %v1866_v9  ;;  %v2335_v49 = vld [vmem:[#allocation9_spill] sm:$0xff] }
  0xf5   : > { %v847_v23 = vsel %vm845_vm9, %v830_v1, %v645_v39  ;;  %v537_v39 = vsel %vm340_vm1, %v534_v35, %v536_v8  ;;  %v690_v35 = vrot.slane %v224_v52, 2 }
  0xf6   : > { %719 = vrot.lane.b32.xlu1 %v535_v47, %s1450_s30 }
  0xf7   : > { %703 = vrot.lane.b32.xlu0 %v1573_v20, %s1450_s30 }
  0xf8   : > { %v714_v2 = vpop.permute.xlu1 %713  ;;  %v698_v3 = vpop.permute.xlu0 %697 }
  0xf9   : > { %v872_v10 = vsel %vm862_vm10, %v855_v22, %v714_v2  ;;  %v864_v4 = vsel %vm862_vm10, %v847_v23, %v698_v3 }
  0xfa   : > { %515 = vrot.lane.b32.xlu1 %v484_v31, %s1446_s10  ;;  %1305 = vmatmul.mubr.msk.f32.vlgmr.msra.gmra.mrb[0].mxu1 %vm891_vm11, %v872_v10  ;;  %v691_v31 = vrot.slane %v225_v7, 2  ;;  %v822_v10 = vsel %vm811_vm7, %v1896_v34, %v1990_v6 }
  0xfb   : > { %499 = vrot.lane.b32.xlu0 %v1561_v16, %s1446_s10  ;;  %1293 = vmatmul.mubr.msk.f32.vlgmr.msra.gmra.mrb[0].mxu0 %vm891_vm11, %v864_v4  ;;  %v748_v16 = vsel %vm743_vm3, %v1657_v53, %v301_v19  ;;  %v814_v4 = vsel %vm811_vm7, %v1899_v55, %v1992_v38 }
  0xfc   : > { %v319_v9 = vpop.permute.xlu1 %318  ;;  %v303_v37 = vpop.permute.xlu0 %302  ;;  %v692_v17 = vsel %vm340_vm1, %v690_v35, %v691_v31 }
  0xfd   : > { %v757_v30 = vsel %vm743_vm3, %v1667_v54, %v319_v9  ;;  %v749_v58 = vsel %vm743_vm3, %v2331_v57, %v303_v37 }
  0xfe   : > { %566 = vrot.lane.b32.xlu1 %v535_v47, %s1447_s11  ;;  %v2334_v47 = vld [vmem:[#allocation8_spill] sm:$0xff] }
  0xff   : > { %550 = vrot.lane.b32.xlu0 %v1573_v20, %s1447_s11 }
 0x100   : > { %v406_v40 = vpop.permute.xlu1 %405  ;;  %v390_v50 = vpop.permute.xlu0 %389 }
 0x101   : > { %v773_v41 = vsel %vm760_vm4, %v756_v13, %v406_v40  ;;  %v765_v59 = vsel %vm760_vm4, %v748_v16, %v390_v50 }
 0x102   : > { %721 = vrot.lane.b32.xlu1 %v537_v39, %s1450_s30 }
 0x103   : > { %705 = vrot.lane.b32.xlu0 %v1580_v24, %s1450_s30 }
 0x104   : > { %v2031_v20 = vpop.permute.xlu1 %560  ;;  %v2033_v60 = vpop.permute.xlu0 %544 }
 0x106   : > { %568 = vrot.lane.b32.xlu1 %v537_v39, %s1447_s11 }
 0x107   : > { %552 = vrot.lane.b32.xlu0 %v1580_v24, %s1447_s11  ;;  %v226_v24 = vld [vmem:[%s1534_s6 + $0xe8] sm:$0x3]  ;;  %s1089_s6 = sld [smem:[#allocation2]]  ;;  %s1235_s11 = sshll.u32 %s189_s7, 7 }
 0x108   : > { %v609_v53 = vpop.permute.xlu1 %608  ;;  %v593_v5 = vpop.permute.xlu0 %592  ;;  %v640_v15 = vrot.slane %v226_v24, 1  ;;  %v693_v46 = vrot.slane %v226_v24, 2 }
 0x109   : > { %v839_v8 = vsel %vm828_vm8, %v822_v10, %v609_v53  ;;  %v831_v9 = vsel %vm828_vm8, %v814_v4, %v593_v5  ;;  %v823_v5 = vsel %vm811_vm7, %v1967_v11, %v2031_v20  ;;  %v2336_v20 = vld [vmem:[#allocation11_spill] sm:$0xff] }
 0x10a   : > { %616 = vrot.lane.b32.xlu1 %v224_v52, %s1448_s12  ;;  %v641_v32 = vsel %vm251_vm0, %v638_v14, %v640_v15  ;;  %v694_v0 = vsel %vm340_vm1, %v691_v31, %v693_v46 }
 0x10b   : > { %600 = vrot.lane.b32.xlu0 %v1587_v26, %s1448_s12  ;;  %v639_v26 = vsel %vm251_vm0, %v637_v25, %v638_v14 }
 0x10c   : > { %v408_v61 = vpop.permute.xlu1 %407  ;;  %v392_v62 = vpop.permute.xlu0 %391 }
 0x10d   : > { %v774_v19 = vsel %vm760_vm4, %v757_v30, %v408_v61  ;;  %v766_v21 = vsel %vm760_vm4, %v749_v58, %v392_v62 }
 0x10e   : > { %618 = vrot.lane.b32.xlu1 %v225_v7, %s1448_s12  ;;  %v815_v7 = vsel %vm811_vm7, %v1970_v12, %v2033_v60 }
 0x10f   : > { %602 = vrot.lane.b32.xlu0 %v1593_v28, %s1448_s12  ;;  %s2195_s12 = scalar_lea.vmem [#allocation3], %s1235_s11 }
 0x110   : > { %v456_v27 = vpop.permute.xlu1 %455  ;;  %v440_v54 = vpop.permute.xlu0 %439  ;;  %s1169_s15 = sshll.u32 %s2195_s12, 4  ;;  %s2254_s15 = int_to_ptr.vmem [resolvable:$true] %s1169_s15 }
 0x111   : > { %v790_v18 = vsel %vm777_vm5, %v773_v41, %v456_v27  ;;  %v782_v33 = vsel %vm777_vm5, %v765_v59, %v440_v54  ;;  %s1379_s24 = scalar_lea.vmem %s2254_s15, 2048  ;;  %p1386_p0 = scmp.lt.s32.totalorder %s2254_s15, %s1384_s29 }
 0x112   : > { %670 = vrot.lane.b32.xlu1 %v639_v26, %s1449_s13  ;;  %p1380_p11 = scmp.ne.s32.totalorder %s2254_s15, %s1379_s24 }
 0x113   : > { %654 = vrot.lane.b32.xlu0 %v2332_v29, %s1449_s13 }
 0x114   : > { %v611_v45 = vpop.permute.xlu1 %610  ;;  %v595_v28 = vpop.permute.xlu0 %594  ;;  %p1381_p12 = pnand %p1380_p11, %p1519_p5 }
 0x115   : > { %v840_v25 = vsel %vm828_vm8, %v823_v5, %v611_v45  ;;  %v832_v14 = vsel %vm828_vm8, %v815_v7, %v595_v28 }
 0x116   : > { %672 = vrot.lane.b32.xlu1 %v641_v32, %s1449_s13  ;;  %p1382_p13 = pneg %p1381_p12 }
 0x117   : > { %656 = vrot.lane.b32.xlu0 %v2333_v48, %s1449_s13  ;;  %s1260_s13 = sshll.u32 %s1502_s3, 11 }
 0x118   : > { %v663_v43 = vpop.permute.xlu1 %662  ;;  %v647_v44 = vpop.permute.xlu0 %646  ;;  %s2250_s21 = scalar_lea.hbm %s2310_s4, %s1260_s13 }
 0x119   : > { %v856_v37 = vsel %vm845_vm9, %v839_v8, %v663_v43  ;;  %v848_v39 = vsel %vm845_vm9, %v831_v9, %v647_v44 }
 0x11a   : > { %723 = vrot.lane.b32.xlu1 %v692_v17, %s1450_s30 }
 0x11b   : > { %707 = vrot.lane.b32.xlu0 %v2334_v47, %s1450_s30 }
 0x11c   : > { %v458_v36 = vpop.permute.xlu1 %457  ;;  %v442_v51 = vpop.permute.xlu0 %441 }
 0x11d   : > { %v791_v56 = vsel %vm777_vm5, %v774_v19, %v458_v36  ;;  %v783_v42 = vsel %vm777_vm5, %v766_v21, %v442_v51  ;;  %v2337_v19 = vld [vmem:[#allocation12_spill] sm:$0xff] }
 0x11e   : > { %725 = vrot.lane.b32.xlu1 %v694_v0, %s1450_s30 }
 0x11f   : > { %709 = vrot.lane.b32.xlu0 %v2335_v49, %s1450_s30  ;;  %s1385_s30 = scalar_lea.vmem %s1384_s29, 4096 }
 0x120   : > { %v510_v63 = vpop.permute.xlu1 %509  ;;  %v494_v1 = vpop.permute.xlu0 %493  ;;  %p1387_p1 = scmp.lt.s32.totalorder %s1385_s30, %s1379_s24 }
 0x121   : > { %v2074_v22 = vsel %vm794_vm6, %v790_v18, %v510_v63  ;;  %v2077_v23 = vsel %vm794_vm6, %v782_v33, %v494_v1 }
 0x122   : > { %p1388_p2 = por %p1387_p1, %p1386_p0 }
 0x124   : > { %v665_v2 = vpop.permute.xlu1 %664  ;;  %v649_v3 = vpop.permute.xlu0 %648  ;;  %p1389_p3 = pnand %p1388_p2, %p1382_p13 }
 0x125   : > { %v857_v30 = vsel %vm845_vm9, %v840_v25, %v665_v2  ;;  %v849_v57 = vsel %vm845_vm9, %v832_v14, %v649_v3 }
 0x128   : > { %v716_v13 = vpop.permute.xlu1 %715  ;;  %v700_v16 = vpop.permute.xlu0 %699 }
 0x129   : > { %v873_v40 = vsel %vm862_vm10, %v856_v37, %v716_v13  ;;  %v865_v50 = vsel %vm862_vm10, %v848_v39, %v700_v16 }
 0x12a   : > { %1295 = vmatprep.mubr.msk.f32.mxu0 %vm891_vm11, %v865_v50  ;;  %1307 = vmatprep.mubr.msk.f32.mxu1 %vm891_vm11, %v873_v40 }
 0x12c   : > { %v321_v34 = vpop.permute.xlu1 %320  ;;  %v305_v55 = vpop.permute.xlu0 %304 }
 0x12d   : > { %v758_v60 = vsel %vm743_vm3, %v2336_v20, %v321_v34  ;;  %v750_v21 = vsel %vm743_vm3, %v2337_v19, %v305_v55 }
 0x130   : > { %v512_v6 = vpop.permute.xlu1 %511  ;;  %v496_v38 = vpop.permute.xlu0 %495 }
 0x131   : > { %v808_v41 = vsel %vm794_vm6, %v791_v56, %v512_v6  ;;  %v800_v59 = vsel %vm794_vm6, %v783_v42, %v496_v38 }
 0x134   : > { %v563_v52 = vpop.permute.xlu1 %562  ;;  %v547_v53 = vpop.permute.xlu0 %546 }
 0x135   : > { %v824_v42 = vsel %vm811_vm7, %v2074_v22, %v563_v52  ;;  %v816_v49 = vsel %vm811_vm7, %v2077_v23, %v547_v53 }
 0x138   : > { %v718_v58 = vpop.permute.xlu1 %717  ;;  %v702_v61 = vpop.permute.xlu0 %701 }
 0x139   : > { %v874_v62 = vsel %vm862_vm10, %v857_v30, %v718_v58  ;;  %v866_v24 = vsel %vm862_vm10, %v849_v57, %v702_v61 }
 0x13a   : > { %1296 = vmatmul.mubr.msk.f32.gmra.mrb[2].mxu0 %vm891_vm11, %v866_v24  ;;  %1308 = vmatmul.mubr.msk.f32.gmra.mrb[2].mxu1 %vm891_vm11, %v874_v62 }
 0x13c   : > { %v2109_v11 = vpop.permute.xlu1 %322  ;;  %v2111_v12 = vpop.permute.xlu0 %306 }
 0x140   : > { %v410_v26 = vpop.permute.xlu1 %409  ;;  %v394_v15 = vpop.permute.xlu0 %393 }
 0x141   : > { %v775_v27 = vsel %vm760_vm4, %v758_v60, %v410_v26  ;;  %v767_v54 = vsel %vm760_vm4, %v750_v21, %v394_v15  ;;  %v2338_v60 = vld [vmem:[#allocation13_spill] sm:$0xff]  ;;  %v2339_v15 = vld [vmem:[#allocation14_spill] sm:$0xff] }
 0x142   : > { %v759_v19 = vsel %vm743_vm3, %v2338_v60, %v2109_v11 }
 0x144   : > { %v565_v18 = vpop.permute.xlu1 %564  ;;  %v549_v33 = vpop.permute.xlu0 %548 }
 0x145   : > { %v825_v13 = vsel %vm811_vm7, %v808_v41, %v565_v18  ;;  %v817_v16 = vsel %vm811_vm7, %v800_v59, %v549_v33  ;;  %v751_v18 = vsel %vm743_vm3, %v2339_v15, %v2111_v12 }
 0x148   : > { %v613_v35 = vpop.permute.xlu1 %612  ;;  %v597_v31 = vpop.permute.xlu0 %596 }
 0x149   : > { %v841_v63 = vsel %vm828_vm8, %v824_v42, %v613_v35  ;;  %v833_v1 = vsel %vm828_vm8, %v816_v49, %v597_v31 }
 0x14c   : > { %v412_v29 = vpop.permute.xlu1 %411  ;;  %v396_v32 = vpop.permute.xlu0 %395 }
 0x14d   : > { %v768_v35 = vsel %vm760_vm4, %v751_v18, %v396_v32 }
 0x150   : > { %v460_v45 = vpop.permute.xlu1 %459  ;;  %v444_v28 = vpop.permute.xlu0 %443 }
 0x151   : > { %v792_v58 = vsel %vm777_vm5, %v775_v27, %v460_v45  ;;  %v784_v62 = vsel %vm777_vm5, %v767_v54, %v444_v28  ;;  %v776_v27 = vsel %vm760_vm4, %v759_v19, %v412_v29 }
 0x154   : > { %v615_v48 = vpop.permute.xlu1 %614  ;;  %v599_v17 = vpop.permute.xlu0 %598 }
 0x155   : > { %v842_v40 = vsel %vm828_vm8, %v825_v13, %v615_v48  ;;  %v834_v50 = vsel %vm828_vm8, %v817_v16, %v599_v17 }
 0x158   : > { %v667_v46 = vpop.permute.xlu1 %666  ;;  %v651_v43 = vpop.permute.xlu0 %650 }
 0x159   : > { %v858_v2 = vsel %vm845_vm9, %v841_v63, %v667_v46  ;;  %v850_v10 = vsel %vm845_vm9, %v833_v1, %v651_v43 }
 0x15c   : > { %v462_v44 = vpop.permute.xlu1 %461 }
 0x15d   : > { %v446_v47 = vpop.permute.xlu0 %445  ;;  %v793_v31 = vsel %vm777_vm5, %v776_v27, %v462_v44 }
 0x15e   : > { %v785_v48 = vsel %vm777_vm5, %v768_v35, %v446_v47 }
 0x160   : > { %v514_v0 = vpop.permute.xlu1 %513 }
 0x161   : > { %v498_v36 = vpop.permute.xlu0 %497  ;;  %v809_v24 = vsel %vm794_vm6, %v792_v58, %v514_v0 }
 0x162   : > { %v801_v21 = vsel %vm794_vm6, %v784_v62, %v498_v36 }
 0x164   : > { %v669_v51 = vpop.permute.xlu1 %668 }
 0x165   : > { %v653_v56 = vpop.permute.xlu0 %652  ;;  %v859_v34 = vsel %vm845_vm9, %v842_v40, %v669_v51 }
 0x166   : > { %v851_v6 = vsel %vm845_vm9, %v834_v50, %v653_v56 }
 0x168   : > { %v720_v3 = vpop.permute.xlu1 %719 }
 0x169   : > { %v875_v4 = vsel %vm862_vm10, %v858_v2, %v720_v3  ;;  %v704_v8 = vpop.permute.xlu0 %703  ;;  %v2181_v2 = vld [vmem:[%s2308_s2] ss:$0 sm:$0xff]  ;;  %v2185_v3 = vstv %s1089_s6 }
 0x16a   : > { %v867_v9 = vsel %vm862_vm10, %v850_v10, %v704_v8  ;;  %1310 = vmatprep.mubr.msk.f32.mxu1 %vm891_vm11, %v875_v4 }
 0x16b   : > { %1298 = vmatprep.mubr.msk.f32.mxu0 %vm891_vm11, %v867_v9 }
 0x16c   : > { %v516_v22 = vpop.permute.xlu1 %515 }
 0x16d   : > { %v500_v23 = vpop.permute.xlu0 %499  ;;  %v810_v17 = vsel %vm794_vm6, %v793_v31, %v516_v22 }
 0x16e   : > { %v802_v43 = vsel %vm794_vm6, %v785_v48, %v500_v23 }
 0x170   : > { %v567_v37 = vpop.permute.xlu1 %566 }
 0x171   : > { %v551_v39 = vpop.permute.xlu0 %550  ;;  %v826_v26 = vsel %vm811_vm7, %v809_v24, %v567_v37 }
 0x172   : > { %v818_v33 = vsel %vm811_vm7, %v801_v21, %v551_v39 }
 0x174   : > { %v722_v55 = vpop.permute.xlu1 %721 }
 0x175   : > { %v876_v38 = vsel %vm862_vm10, %v859_v34, %v722_v55  ;;  %v706_v52 = vpop.permute.xlu0 %705 }
 0x176   : > { %v868_v53 = vsel %vm862_vm10, %v851_v6, %v706_v52  ;;  %1311 = vmatmul.mubr.msk.f32.gmra.mrb[4].mxu1 %vm891_vm11, %v876_v38 }
 0x177   : > { %1299 = vmatmul.mubr.msk.f32.gmra.mrb[4].mxu0 %vm891_vm11, %v868_v53 }
 0x178   : > { %v569_v41 = vpop.permute.xlu1 %568 }
 0x179   : > { %v553_v59 = vpop.permute.xlu0 %552  ;;  %v827_v32 = vsel %vm811_vm7, %v810_v17, %v569_v41 }
 0x17a   : > { %v819_v0 = vsel %vm811_vm7, %v802_v43, %v553_v59 }
 0x17c   : > { %v617_v5 = vpop.permute.xlu1 %616 }
 0x17d   : > { %v601_v7 = vpop.permute.xlu0 %600  ;;  %v843_v54 = vsel %vm828_vm8, %v826_v26, %v617_v5 }
 0x17e   : > { %v835_v11 = vsel %vm828_vm8, %v818_v33, %v601_v7 }
 0x180   : > { %v619_v25 = vpop.permute.xlu1 %618 }
 0x181   : > { %v603_v14 = vpop.permute.xlu0 %602  ;;  %v844_v47 = vsel %vm828_vm8, %v827_v32, %v619_v25 }
 0x182   : > { %v836_v36 = vsel %vm828_vm8, %v819_v0, %v603_v14 }
 0x184   : > { %v671_v30 = vpop.permute.xlu1 %670 }
 0x185   : > { %v655_v57 = vpop.permute.xlu0 %654  ;;  %v860_v45 = vsel %vm845_vm9, %v843_v54, %v671_v30 }
 0x186   : > { %v852_v12 = vsel %vm845_vm9, %v835_v11, %v655_v57 }
 0x188   : > { %v673_v61 = vpop.permute.xlu1 %672 }
 0x189   : > { %v657_v20 = vpop.permute.xlu0 %656  ;;  %v861_v51 = vsel %vm845_vm9, %v844_v47, %v673_v61 }
 0x18a   : > { %v853_v42 = vsel %vm845_vm9, %v836_v36, %v657_v20 }
 0x18c   : > { %v724_v28 = vpop.permute.xlu1 %723 }
 0x18d   : > { %v877_v29 = vsel %vm862_vm10, %v860_v45, %v724_v28  ;;  %v708_v46 = vpop.permute.xlu0 %707 }
 0x18e   : > { %v869_v44 = vsel %vm862_vm10, %v852_v12, %v708_v46  ;;  %1313 = vmatprep.mubr.msk.f32.mxu1 %vm891_vm11, %v877_v29 }
 0x18f   : > { %1301 = vmatprep.mubr.msk.f32.mxu0 %vm891_vm11, %v869_v44 }
 0x190   : > { %v726_v56 = vpop.permute.xlu1 %725 }
 0x191   : > { %v878_v49 = vsel %vm862_vm10, %v861_v51, %v726_v56  ;;  %v710_v63 = vpop.permute.xlu0 %709 }
 0x192   : > { %v870_v1 = vsel %vm862_vm10, %v853_v42, %v710_v63  ;;  %1314 = vmatmul.mubr.msk.f32.gmra.mrb[6].mxu1 %vm891_vm11, %v878_v49 }
 0x193   : > { %1302 = vmatmul.mubr.msk.f32.gmra.mrb[6].mxu0 %vm891_vm11, %v870_v1 }
 0x1cd   : > { %v1306_v10 = vpop.f32.mrb[0].mxu1 }
 0x1ce   : > { %v1294_v4 = vpop.f32.mrb[0].mxu0  ;;  %v1056_v8 = vadd.f32 %v1306_v10, %v2181_v2  ;;  %v1050_v9 = vpop.f32.mrb[1].mxu1 }
 0x1cf   : > { %v1016_v22 = vadd.f32 %v1294_v4, %v2181_v2  ;;  %v1010_v23 = vpop.f32.mrb[1].mxu0  ;;  %v1051_v37 = vadd.f32 %v2181_v2, %v1050_v9 }
 0x1d0   : > { %vm1099_vm12 = vcmp.ge.f32.partialorder %v1056_v8, 0.0  ;;  %v1116_v39 = vmul.f32 %v2185_v3, %v1056_v8  ;;  %v1011_v13 = vadd.f32 %v2181_v2, %v1010_v23 }
 0x1d1   : > { %vm1091_vm13 = vcmp.ge.f32.partialorder %v1016_v22, 0.0  ;;  %v1108_v16 = vmul.f32 %v2185_v3, %v1016_v22  ;;  %vm1098_vm14 = vcmp.ge.f32.partialorder %v1051_v37, 0.0  ;;  %v1115_v40 = vmul.f32 %v2185_v3, %v1051_v37 }
 0x1d2   : > { %v1132_v50 = vsel %vm1099_vm12, %v1056_v8, %v1116_v39  ;;  %vm1090_vm15 = vcmp.ge.f32.partialorder %v1011_v13, 0.0  ;;  %v1107_v34 = vmul.f32 %v2185_v3, %v1011_v13 }
 0x1d3   : > { %v1124_v55 = vsel %vm1091_vm13, %v1016_v22, %v1108_v16  ;;  %1148 = vst.msk [vmem:[%s2195_s12 + $0x48] sm:$0xff] %vm794_vm6, %v1132_v50  ;;  %v1131_v6 = vsel %vm1098_vm14, %v1051_v37, %v1115_v40 }
 0x1d4   : > { %1140 = vst.msk [vmem:[%s2195_s12 + $0x8] sm:$0xff] %vm794_vm6, %v1124_v55  ;;  %v1123_v38 = vsel %vm1090_vm15, %v1011_v13, %v1107_v34  ;;  %1147 = vst.msk [vmem:[%s2195_s12 + $0x40] sm:$0xff] %vm794_vm6, %v1131_v6 }
 0x1d5   : > { %1139 = vst.msk [vmem:[%s2195_s12] sm:$0xff] %vm794_vm6, %v1123_v38 }
 0x20d   : > { %v1297_v52 = vpop.f32.mrb[2].mxu0  ;;  %v1309_v53 = vpop.f32.mrb[2].mxu1 }
 0x20e   : > { %v1026_v41 = vadd.f32 %v1297_v52, %v2181_v2  ;;  %v1066_v59 = vadd.f32 %v1309_v53, %v2181_v2  ;;  %v1020_v5 = vpop.f32.mrb[3].mxu0  ;;  %v1060_v7 = vpop.f32.mrb[3].mxu1 }
 0x20f   : > { %v1021_v25 = vadd.f32 %v2181_v2, %v1020_v5  ;;  %v1061_v14 = vadd.f32 %v2181_v2, %v1060_v7 }
 0x210   : > { %vm1093_vm0 = vcmp.ge.f32.partialorder %v1026_v41, 0.0  ;;  %v1110_v30 = vmul.f32 %v2185_v3, %v1026_v41  ;;  %vm1101_vm1 = vcmp.ge.f32.partialorder %v1066_v59, 0.0  ;;  %v1118_v57 = vmul.f32 %v2185_v3, %v1066_v59 }
 0x211   : > { %vm1092_vm2 = vcmp.ge.f32.partialorder %v1021_v25, 0.0  ;;  %v1109_v58 = vmul.f32 %v2185_v3, %v1021_v25  ;;  %vm1100_vm3 = vcmp.ge.f32.partialorder %v1061_v14, 0.0  ;;  %v1117_v61 = vmul.f32 %v2185_v3, %v1061_v14 }
 0x212   : > { %v1126_v62 = vsel %vm1093_vm0, %v1026_v41, %v1110_v30  ;;  %v1134_v24 = vsel %vm1101_vm1, %v1066_v59, %v1118_v57 }
 0x213   : > { %1142 = vst.msk [vmem:[%s2195_s12 + $0x18] sm:$0xff] %vm794_vm6, %v1126_v62  ;;  %1150 = vst.msk [vmem:[%s2195_s12 + $0x58] sm:$0xff] %vm794_vm6, %v1134_v24  ;;  %v1125_v20 = vsel %vm1092_vm2, %v1021_v25, %v1109_v58  ;;  %v1133_v60 = vsel %vm1100_vm3, %v1061_v14, %v1117_v61 }
 0x214   : > { %1141 = vst.msk [vmem:[%s2195_s12 + $0x10] sm:$0xff] %vm794_vm6, %v1125_v20  ;;  %1149 = vst.msk [vmem:[%s2195_s12 + $0x50] sm:$0xff] %vm794_vm6, %v1133_v60 }
 0x249   : > { %v1312_v19 = vpop.f32.mrb[4].mxu1 }
 0x24a   : > { %v1300_v21 = vpop.f32.mrb[4].mxu0  ;;  %v1076_v26 = vadd.f32 %v1312_v19, %v2181_v2  ;;  %v1070_v15 = vpop.f32.mrb[5].mxu1 }
 0x24b   : > { %v1036_v18 = vadd.f32 %v1300_v21, %v2181_v2  ;;  %v1030_v27 = vpop.f32.mrb[5].mxu0  ;;  %v1071_v33 = vadd.f32 %v2181_v2, %v1070_v15 }
 0x24c   : > { %vm1103_vm4 = vcmp.ge.f32.partialorder %v1076_v26, 0.0  ;;  %v1120_v54 = vmul.f32 %v2185_v3, %v1076_v26  ;;  %v1031_v35 = vadd.f32 %v2181_v2, %v1030_v27 }
 0x24d   : > { %vm1095_vm5 = vcmp.ge.f32.partialorder %v1036_v18, 0.0  ;;  %v1112_v31 = vmul.f32 %v2185_v3, %v1036_v18  ;;  %vm1102_vm7 = vcmp.ge.f32.partialorder %v1071_v33, 0.0  ;;  %v1119_v11 = vmul.f32 %v2185_v3, %v1071_v33 }
 0x24e   : > { %v1136_v45 = vsel %vm1103_vm4, %v1076_v26, %v1120_v54  ;;  %vm1094_vm8 = vcmp.ge.f32.partialorder %v1031_v35, 0.0  ;;  %v1111_v28 = vmul.f32 %v2185_v3, %v1031_v35 }
 0x24f   : > { %v1128_v48 = vsel %vm1095_vm5, %v1036_v18, %v1112_v31  ;;  %1152 = vst.msk [vmem:[%s2195_s12 + $0x68] sm:$0xff] %vm794_vm6, %v1136_v45  ;;  %v1135_v17 = vsel %vm1102_vm7, %v1071_v33, %v1119_v11 }
 0x250   : > { %1144 = vst.msk [vmem:[%s2195_s12 + $0x28] sm:$0xff] %vm794_vm6, %v1128_v48  ;;  %v1127_v12 = vsel %vm1094_vm8, %v1031_v35, %v1111_v28  ;;  %1151 = vst.msk [vmem:[%s2195_s12 + $0x60] sm:$0xff] %vm794_vm6, %v1135_v17 }
 0x251   : > { %1143 = vst.msk [vmem:[%s2195_s12 + $0x20] sm:$0xff] %vm794_vm6, %v1127_v12 }
 0x265   : > { %v1315_v29 = vpop.f32.mrb[6].mxu1 }
 0x266   : > { %v1303_v46 = vpop.f32.mrb[6].mxu0  ;;  %v1086_v43 = vadd.f32 %v1315_v29, %v2181_v2  ;;  %v1080_v32 = vpop.f32.mrb[7].mxu1 }
 0x267   : > { %v1046_v44 = vadd.f32 %v1303_v46, %v2181_v2  ;;  %v1040_v0 = vpop.f32.mrb[7].mxu0  ;;  %v1081_v47 = vadd.f32 %v2181_v2, %v1080_v32 }
 0x268   : > { %vm1105_vm9 = vcmp.ge.f32.partialorder %v1086_v43, 0.0  ;;  %v1122_v36 = vmul.f32 %v2185_v3, %v1086_v43  ;;  %v1041_v51 = vadd.f32 %v2181_v2, %v1040_v0 }
 0x269   : > { %vm1097_vm10 = vcmp.ge.f32.partialorder %v1046_v44, 0.0  ;;  %v1114_v56 = vmul.f32 %v2185_v3, %v1046_v44  ;;  %vm1104_vm11 = vcmp.ge.f32.partialorder %v1081_v47, 0.0  ;;  %v1121_v42 = vmul.f32 %v2185_v3, %v1081_v47 }
 0x26a   : > { %v1138_v49 = vsel %vm1105_vm9, %v1086_v43, %v1122_v36  ;;  %vm1096_vm12 = vcmp.ge.f32.partialorder %v1041_v51, 0.0  ;;  %v1113_v63 = vmul.f32 %v2185_v3, %v1041_v51 }
 0x26b   : > { %v1130_v1 = vsel %vm1097_vm10, %v1046_v44, %v1114_v56  ;;  %1154 = vst.msk [vmem:[%s2195_s12 + $0x78] sm:$0xff] %vm794_vm6, %v1138_v49  ;;  %v1137_v2 = vsel %vm1104_vm11, %v1081_v47, %v1121_v42 }
 0x26c   : > { %1146 = vst.msk [vmem:[%s2195_s12 + $0x38] sm:$0xff] %vm794_vm6, %v1130_v1  ;;  %v1129_v10 = vsel %vm1096_vm12, %v1041_v51, %v1113_v63  ;;  %1153 = vst.msk [vmem:[%s2195_s12 + $0x70] sm:$0xff] %vm794_vm6, %v1137_v2 }
 0x26d   : > { %1145 = vst.msk [vmem:[%s2195_s12 + $0x30] sm:$0xff] %vm794_vm6, %v1129_v10 }
 0x26e   : > { %1392 = shalt.err (!%p1389_p3)
}
 0x26f   : > { %s1393_s5 = scalar_lea.hbm %s2250_s21, 2048  ;;  %s1397_s7 = scalar_lea.hbm %s2310_s4, 8192 }
 0x270   : > { %p1394_p4 = scmp.ne.s32.totalorder %s2250_s21, %s1393_s5  ;;  %p1398_p9 = scmp.lt.u32.totalorder %s2250_s21, %s2310_s4 }
 0x271   : > { %p1399_p10 = scmp.lt.u32.totalorder %s1397_s7, %s1393_s5  ;;  %p1401_p12 = scmp.lt.u32.totalorder %s1393_s5, %s2250_s21 }
 0x272   : > { %p1395_p7 = pnand %p1394_p4, %p1519_p5 }
 0x273   : > { %p1400_p11 = por %p1399_p10, %p1398_p9 }
 0x274   : > { %p1396_p8 = pneg %p1395_p7 }
 0x275   : > { %p1402_p13 = por %p1401_p12, %p1400_p11 }
 0x277   : > { %p1403_p0 = pnand %p1402_p13, %p1396_p8 }
 0x279   : > { %1406 = shalt.err (!%p1403_p0)
}
 0x27a   : > { %s1452_s11 = smov 128  }
 0x27b   : > { %1331 = dma.vmem_to_hbm [thread:$0]  (%p1519_p5), %s2254_s15, 2048, %s2250_s21, %s2264_s23, %s1452_s11, %s1452_s11, %s1444_s8  }
 0x27c PF: > { %p1337_p1 = scmp.ge.s32.totalorder %s1441_s20, 2  ;;  %s1184_s12 = sand.u32 1, %s1429_s17  }
 0x27d   : > { %s1185_s13 = scalar_lea.sflag [#allocation4], %s1184_s12 }
 0x27e   : > { %p1334_p2 = pnand %p1337_p1, %p1523_p6 }
 0x280   : > { %1424 = dma.done.wait (!%p1334_p2), %s1185_s13, 2048  }
 0x281   : > { %1426 = vsyncadd (!%p1334_p2), %s1185_s13, 4294965248  ;;  %p15_p3 = scmp.ge.s32.totalorder %s1506_s22, 6   ;;  %s2340_s17 = smov %s1433_s18 }
 0x282   : > { %s2341_s18 = smov %s1437_s19  ;;  %s2342_s19 = smov %s1517_s25 }
 0x283   : > { %s2343_s20 = smov %s1506_s22  ;;  %17 = sbr.rel (!%p15_p3) target bundleno = 5 (0x5), region = 71 }
 0x28a   :  { %1190 = vsyncpa [#allocation4], 1 }
 0x28b   :  { %1192 = vsyncpa [#allocation4 + $0x1], 1 }

</bundles_post_ra>
